<compile_context>
chip_gen: v7x
topology: tpu7x:2x2x1
jax: 0.10.0
libtpu: 0.0.40
codegen_flags: <defaults>
</compile_context>

<pallas_src>
import functools

import jax
import jax.numpy as jnp
from jax import lax
from jax.experimental import pallas as pl
from jax.experimental.pallas import tpu as pltpu

LN_EPS = 1e-5
LANE = 128
_VMEM_LIMIT = 48 * 1024 * 1024  # safe on v7x (64 MiB/TC); can be raised on v5e/v6e


def _round_up(x, m):
    return ((x + m - 1) // m) * m


def _pad2d(x, rows=None, cols=None):
    r = 0 if rows is None else rows - x.shape[0]
    c = 0 if cols is None else cols - x.shape[1]
    if r == 0 and c == 0:
        return x
    return jnp.pad(x, ((0, r), (0, c)))


# ----------------------------------------------------------------------------
# Kernel 1: fused  out = relu(LayerNorm(sum_i x_i @ W_i))  (+ optional residual)
# ----------------------------------------------------------------------------
def _fused_kernel(*refs, d_true, n_x, has_res):
    xs = refs[:n_x]
    ws = refs[n_x:2 * n_x]
    g_ref, bt_ref = refs[2 * n_x], refs[2 * n_x + 1]
    h_ref = refs[2 * n_x + 2] if has_res else None
    o_ref = refs[-1]

    # bf16 MXU inputs (cast in the wrapper), f32 accumulation.
    y = jnp.dot(xs[0][...], ws[0][...], preferred_element_type=jnp.float32)
    for i in range(1, n_x):
        y = y + jnp.dot(xs[i][...], ws[i][...], preferred_element_type=jnp.float32)

    # Two-pass LayerNorm over the true feature width d_true. Padded weight
    # columns are zero, so padded columns of y are exactly zero and the plain
    # row sum for the mean is correct; padded lanes are masked out of the
    # variance (y - mean there would be -mean, not zero).
    Dp = y.shape[-1]
    inv_d = 1.0 / float(d_true)
    mean = jnp.sum(y, axis=-1, keepdims=True) * inv_d
    centered = y - mean
    if d_true != Dp:
        col = lax.broadcasted_iota(jnp.int32, (1, Dp), 1)
        centered = jnp.where(col < d_true, centered, 0.0)
    var = jnp.sum(centered * centered, axis=-1, keepdims=True) * inv_d
    y = centered * lax.rsqrt(var + LN_EPS) * g_ref[...] + bt_ref[...]

    out = jnp.maximum(y, 0.0)
    if h_ref is not None:
        out = out + h_ref[...]
    o_ref[...] = out.astype(o_ref.dtype)


def fused_matmul_ln_relu(xs, ws, gamma, beta, *, d_true, row_tile, res=None,
                         out_dtype=jnp.float32):
    """relu(LayerNorm(sum_i xs[i] @ ws[i])) (+ res). Rows pre-padded to row_tile."""
    n_x = len(xs)
    R = xs[0].shape[0]
    Dp = ws[0].shape[1]
    assert R % row_tile == 0
    for x, w in zip(xs, ws):
        assert x.shape[0] == R and w.shape == (x.shape[1], Dp)

    inputs = list(xs) + list(ws) + [gamma, beta]
    in_specs = (
        [pl.BlockSpec((row_tile, x.shape[1]), lambda i: (i, 0)) for x in xs]
        + [pl.BlockSpec(w.shape, lambda i: (0, 0)) for w in ws]
        + [pl.BlockSpec((1, Dp), lambda i: (0, 0)),
           pl.BlockSpec((1, Dp), lambda i: (0, 0))]
    )
    if res is not None:
        inputs.append(res)
        in_specs.append(pl.BlockSpec((row_tile, Dp), lambda i: (i, 0)))

    flops = 2 * R * sum(int(x.shape[1]) for x in xs) * Dp
    bytes_accessed = int(sum(int(v.size) * v.dtype.itemsize for v in inputs)
                         + R * Dp * jnp.dtype(out_dtype).itemsize)

    kernel = functools.partial(_fused_kernel, d_true=d_true, n_x=n_x,
                               has_res=res is not None)
    return pl.pallas_call(
        kernel,
        out_shape=jax.ShapeDtypeStruct((R, Dp), out_dtype),
        grid=(R // row_tile,),
        in_specs=in_specs,
        out_specs=pl.BlockSpec((row_tile, Dp), lambda i: (i, 0)),
        compiler_params=pltpu.CompilerParams(
            dimension_semantics=("parallel",),
            vmem_limit_bytes=_VMEM_LIMIT),
        cost_estimate=pl.CostEstimate(flops=int(flops), transcendentals=int(R),
                                      bytes_accessed=bytes_accessed),
    )(*inputs)


# ----------------------------------------------------------------------------
# Kernel 2: tiled scatter aggregation over edges -> nodes (sum / mean / max)
# ----------------------------------------------------------------------------
def _scatter_sum_kernel(dst_ref, msg_ref, o_ref, acc_ref):
    ei = pl.program_id(1)
    tn = acc_ref.shape[0]
    te = msg_ref.shape[0]

    @pl.when(ei == 0)
    def _():
        acc_ref[...] = jnp.zeros_like(acc_ref)

    node_ids = pl.program_id(0) * tn + lax.broadcasted_iota(jnp.int32, (tn, te), 0)
    onehot = (node_ids == dst_ref[...]).astype(jnp.bfloat16)        # (tn, te)
    acc_ref[...] += jnp.dot(onehot, msg_ref[...],
                            preferred_element_type=jnp.float32)

    @pl.when(ei == pl.num_programs(1) - 1)
    def _():
        o_ref[...] = acc_ref[...].astype(o_ref.dtype)


def _scatter_mean_kernel(dst_ref, msg_ref, invdeg_ref, o_ref, acc_ref):
    ei = pl.program_id(1)
    tn = acc_ref.shape[0]
    te = msg_ref.shape[0]

    @pl.when(ei == 0)
    def _():
        acc_ref[...] = jnp.zeros_like(acc_ref)

    node_ids = pl.program_id(0) * tn + lax.broadcasted_iota(jnp.int32, (tn, te), 0)
    onehot = (node_ids == dst_ref[...]).astype(jnp.bfloat16)
    acc_ref[...] += jnp.dot(onehot, msg_ref[...],
                            preferred_element_type=jnp.float32)

    @pl.when(ei == pl.num_programs(1) - 1)
    def _():
        o_ref[...] = (acc_ref[...] * invdeg_ref[...]).astype(o_ref.dtype)


def _scatter_max_kernel(dst_sm, msg_ref, o_ref, acc_ref):
    # dst_sm: full (E_pad,) int32 in SMEM via scalar prefetch.
    ni = pl.program_id(0)
    ei = pl.program_id(1)
    tn = acc_ref.shape[0]
    te = msg_ref.shape[0]

    @pl.when(ei == 0)
    def _():
        # messages are post-ReLU (>= 0): zero init matches scatter_max zero-fill
        acc_ref[...] = jnp.zeros_like(acc_ref)

    base_node = ni * tn
    base_edge = ei * te

    @pl.loop(0, te)
    def _(e):
        local = dst_sm[base_edge + e] - base_node     # scalar SMEM read

        @pl.when(jnp.logical_and(local >= 0, local < tn))
        def _():
            row = msg_ref[pl.ds(e, 1), :].astype(jnp.float32)        # (1, Dp)
            cur = acc_ref[pl.ds(local, 1), :]
            acc_ref[pl.ds(local, 1), :] = jnp.maximum(cur, row)

    @pl.when(ei == pl.num_programs(1) - 1)
    def _():
        o_ref[...] = acc_ref[...].astype(o_ref.dtype)


def scatter_aggregate(msg, dst_pad, num_nodes_pad, *, aggr_type, node_tile,
                      edge_tile, inv_deg=None):
    """msg: (E_pad, Dp) bf16; dst_pad: (E_pad,) int32 (-1 sentinel for pad rows)."""
    E_pad, Dp = msg.shape
    assert E_pad % edge_tile == 0 and num_nodes_pad % node_tile == 0
    grid = (num_nodes_pad // node_tile, E_pad // edge_tile)

    out_shape = jax.ShapeDtypeStruct((num_nodes_pad, Dp), jnp.bfloat16)
    scratch = [pltpu.VMEM((node_tile, Dp), jnp.float32)]
    cparams = pltpu.CompilerParams(
        dimension_semantics=("parallel", "arbitrary"),
        vmem_limit_bytes=_VMEM_LIMIT)
    # msg is re-read once per node tile -> dominant HBM term.
    bytes_accessed = int(grid[0] * int(msg.size) * msg.dtype.itemsize
                         + int(dst_pad.size) * 4 * grid[0]
                         + num_nodes_pad * Dp * 2)
    flops = int(2 * num_nodes_pad * E_pad * Dp) if aggr_type in ("sum", "mean") else 0
    cost = pl.CostEstimate(flops=flops, transcendentals=0,
                           bytes_accessed=bytes_accessed)

    if aggr_type == "max":
        return pl.pallas_call(
            _scatter_max_kernel,
            out_shape=out_shape,
            grid_spec=pltpu.PrefetchScalarGridSpec(
                num_scalar_prefetch=1,
                grid=grid,
                in_specs=[pl.BlockSpec((edge_tile, Dp), lambda ni, ei, dst: (ei, 0))],
                out_specs=pl.BlockSpec((node_tile, Dp), lambda ni, ei, dst: (ni, 0)),
                scratch_shapes=scratch),
            compiler_params=cparams,
            cost_estimate=cost,
        )(dst_pad, msg)

    if aggr_type == "mean":
        assert inv_deg is not None
        kernel = _scatter_mean_kernel
        inputs = [dst_pad.reshape(1, E_pad), msg, inv_deg]
        in_specs = [
            pl.BlockSpec((1, edge_tile), lambda ni, ei: (0, ei)),
            pl.BlockSpec((edge_tile, Dp), lambda ni, ei: (ei, 0)),
            pl.BlockSpec((node_tile, 1), lambda ni, ei: (ni, 0)),
        ]
    elif aggr_type == "sum":
        kernel = _scatter_sum_kernel
        inputs = [dst_pad.reshape(1, E_pad), msg]
        in_specs = [
            pl.BlockSpec((1, edge_tile), lambda ni, ei: (0, ei)),
            pl.BlockSpec((edge_tile, Dp), lambda ni, ei: (ei, 0)),
        ]
    else:
        raise ValueError("aggr_type must be one of max/sum/mean")

    return pl.pallas_call(
        kernel,
        out_shape=out_shape,
        grid=grid,
        in_specs=in_specs,
        out_specs=pl.BlockSpec((node_tile, Dp), lambda ni, ei: (ni, 0)),
        scratch_shapes=scratch,
        compiler_params=cparams,
        cost_estimate=cost,
    )(*inputs)


# ----------------------------------------------------------------------------
# GNN layer forward (mirrors GNN_Layer.forward)
# ----------------------------------------------------------------------------
def gnn_layer_forward(H, idx, X_e, params, aggr_type="sum", res_conn=True,
                      node_tile=1024, edge_tile=1024):
    H = H.astype(jnp.float32)
    X_e = X_e.astype(jnp.float32)
    N, d_h = H.shape
    E, d_e = X_e.shape
    W1 = params["W1"].astype(jnp.float32)
    W2 = params["W2"].astype(jnp.float32)
    hidden = W1.shape[1]
    if W1.shape[0] != d_h + d_e or W2.shape[0] != d_h + hidden:
        raise ValueError("parameter shapes inconsistent with inputs")
    if res_conn and d_h != hidden:
        raise ValueError("res_conn requires d_h == hidden_dim")

    Dp = _round_up(hidden, LANE)                 # lane-padded feature width
    te = min(edge_tile, _round_up(E, LANE))      # edge-row tile (multiple of 128)
    tn = min(node_tile, _round_up(N, 16))        # node-row tile (multiple of 16, bf16-safe)
    E_pad = _round_up(E, te)
    N_pad = _round_up(N, tn)

    src = idx[0].astype(jnp.int32)
    dst = idx[1].astype(jnp.int32)

    # ---- message MLP: relu(LN([H[src] | X_e] @ W1)) -------------------------
    # pack into one lane-dense bf16 slab (K padded to a multiple of 128) -> one
    # deep MXU push per tile and half the input HBM bytes of an f32 stream.
    K1 = d_h + d_e
    K1p = _round_up(K1, LANE)
    x1 = jnp.concatenate([jnp.take(H, src, axis=0), X_e], axis=1).astype(jnp.bfloat16)
    x1 = _pad2d(x1, rows=E_pad, cols=K1p)                            # (E_pad, K1p)
    w1 = _pad2d(W1, rows=K1p, cols=Dp).astype(jnp.bfloat16)          # (K1p, Dp)
    g1 = _pad2d(params["g1"].reshape(1, -1).astype(jnp.float32), cols=Dp)
    b1 = _pad2d(params["b1"].reshape(1, -1).astype(jnp.float32), cols=Dp)

    msg = fused_matmul_ln_relu([x1], [w1], g1, b1, d_true=hidden, row_tile=te,
                               out_dtype=jnp.bfloat16)               # (E_pad, Dp) bf16

    # ---- scatter aggregation over edges -> nodes ----------------------------
    dst_pad = jnp.pad(dst, (0, E_pad - E), constant_values=-1)       # sentinel
    inv_deg = None
    if aggr_type == "mean":
        deg = jnp.zeros((N,), jnp.float32).at[dst].add(1.0)
        inv_deg = _pad2d((1.0 / jnp.maximum(deg, 1.0)).reshape(N, 1), rows=N_pad)
    agg = scatter_aggregate(msg, dst_pad, N_pad, aggr_type=aggr_type,
                            node_tile=tn, edge_tile=te, inv_deg=inv_deg)  # (N_pad, Dp) bf16

    # ---- update MLP: relu(LN(H @ W2[:d_h] + agg @ W2[d_h:])) (+ H) ----------
    h_rows = _pad2d(H, rows=N_pad).astype(jnp.bfloat16)              # (N_pad, d_h) bf16
    w2a = _pad2d(W2[:d_h], cols=Dp).astype(jnp.bfloat16)             # (d_h, Dp)
    w2b = _pad2d(W2[d_h:], rows=Dp, cols=Dp).astype(jnp.bfloat16)    # (Dp, Dp)
    g2 = _pad2d(params["g2"].reshape(1, -1).astype(jnp.float32), cols=Dp)
    b2 = _pad2d(params["b2"].reshape(1, -1).astype(jnp.float32), cols=Dp)
    res = _pad2d(H, rows=N_pad, cols=Dp) if res_conn else None       # f32 residual

    out = fused_matmul_ln_relu([h_rows, agg], [w2a, w2b], g2, b2,
                               d_true=hidden, row_tile=tn,
                               res=res, out_dtype=jnp.float32)
    return out[:N, :hidden]


# ----------------------------------------------------------------------------
# Parameter init (kaiming_normal_, LayerNorm ones/zeros) and plain-JAX reference
# ----------------------------------------------------------------------------
def init_params(key, dim_in, hidden_dim, hidden_dim2):
    k1, k2 = jax.random.split(key)
    # torch.nn.init.kaiming_normal_ uses fan_in = tensor.size(1) = hidden_dim
    # for both W1 (dim_in, hidden_dim) and W2 (hidden_dim2, hidden_dim).
    std = (2.0 / hidden_dim) ** 0.5
    return {
        "W1": std * jax.random.normal(k1, (dim_in, hidden_dim), jnp.float32),
        "W2": std * jax.random.normal(k2, (hidden_dim2, hidden_dim), jnp.float32),
        "g1": jnp.ones((hidden_dim,), jnp.float32),
        "b1": jnp.zeros((hidden_dim,), jnp.float32),
        "g2": jnp.ones((hidden_dim,), jnp.float32),
        "b2": jnp.zeros((hidden_dim,), jnp.float32),
    }


def _layer_norm_ref(y, gamma, beta):
    mean = jnp.mean(y, axis=-1, keepdims=True)
    var = jnp.mean(jnp.square(y - mean), axis=-1, keepdims=True)
    return (y - mean) / jnp.sqrt(var + LN_EPS) * gamma + beta


def reference_forward(H, idx, X_e, params, aggr_type, res_conn):
    N = H.shape[0]
    x = jnp.concatenate([H[idx[0]], X_e], axis=1)
    y = jnp.maximum(_layer_norm_ref(x @ params["W1"], params["g1"], params["b1"]), 0.0)
    dst = idx[1]
    D = y.shape[1]
    if aggr_type == "sum":
        agg = jnp.zeros((N, D), jnp.float32).at[dst].add(y)
    elif aggr_type == "mean":
        s = jnp.zeros((N, D), jnp.float32).at[dst].add(y)
        cnt = jnp.zeros((N,), jnp.float32).at[dst].add(1.0)
        agg = s / jnp.maximum(cnt, 1.0)[:, None]
    else:
        agg = jnp.zeros((N, D), jnp.float32).at[dst].max(y)
    y2 = jnp.concatenate([H, agg], axis=1)
    z = jnp.maximum(_layer_norm_ref(y2 @ params["W2"], params["g2"], params["b2"]), 0.0)
    if res_conn:
        z = z + H
    return z


if __name__ == "__main__":
    # small synthetic graph
    N, E = 16, 64
    d_h, d_e = 32, 16
    hidden_dim = 32                   # == d_h so res_conn is valid
    dim_in = d_h + d_e                # 48
    hidden_dim2 = d_h + hidden_dim    # 64

    key = jax.random.PRNGKey(0)
    kH, kE, kS, kD, kP = jax.random.split(key, 5)
    H = jax.random.normal(kH, (N, d_h), jnp.float32)
    X_e = jax.random.normal(kE, (E, d_e), jnp.float32)
    src = jax.random.randint(kS, (E,), 0, N, jnp.int32)
    dst = jax.random.randint(kD, (E,), 0, N, jnp.int32)
    idx = jnp.stack([src, dst], axis=0)          # (2, E)
    params = init_params(kP, dim_in, hidden_dim, hidden_dim2)

    for aggr in ("sum", "mean", "max"):
        fwd = jax.jit(functools.partial(gnn_layer_forward,
                                        aggr_type=aggr, res_conn=True))
        out = jax.block_until_ready(fwd(H, idx, X_e, params))
        assert out.shape == (N, hidden_dim) and out.dtype == jnp.float32
        assert bool(jnp.all(jnp.isfinite(out))), aggr
        ref = reference_forward(H, idx, X_e, params, aggr, True)
        err = float(jnp.max(jnp.abs(out - ref)))
        assert err < 0.25, (aggr, err)           # loose: bf16 MXU inputs vs f32 ref

    print("KERNEL_OK")
</pallas_src>

<mosaic_0001>
module attributes {stable_mosaic.version = 11 : i64} {
  func.func @_fused_kernel(%arg0: i32, %arg1: memref<128x128xbf16, #tpu.memory_space<vmem>>, %arg2: memref<128x128xbf16, #tpu.memory_space<vmem>>, %arg3: memref<1x128xf32, #tpu.memory_space<vmem>>, %arg4: memref<1x128xf32, #tpu.memory_space<vmem>>, %arg5: memref<128x128xbf16, #tpu.memory_space<vmem>>) attributes {dimension_semantics = [#tpu.dimension_semantics<parallel>], iteration_bounds = array<i64: 1>, scalar_prefetch = 0 : i64, scratch_operands = 0 : i64, tpu.core_type = #tpu.core_type<tc>, window_params = [{transform_indices = @transform_0, window_bounds = array<i64: 128, 128>}, {pipeline_mode = #tpu.pipeline_mode<synchronous>, transform_indices = @transform_1, window_bounds = array<i64: 128, 128>}, {pipeline_mode = #tpu.pipeline_mode<synchronous>, transform_indices = @transform_2, window_bounds = array<i64: 1, 128>}, {pipeline_mode = #tpu.pipeline_mode<synchronous>, transform_indices = @transform_3, window_bounds = array<i64: 1, 128>}, {transform_indices = @transform_4, window_bounds = array<i64: 128, 128>}]} {
    %c0 = arith.constant 0 : index
    %c0_0 = arith.constant 0 : index
    %0 = vector.load %arg1[%c0, %c0_0] : memref<128x128xbf16, #tpu.memory_space<vmem>>, vector<128x128xbf16>
    %c0_1 = arith.constant 0 : index
    %c0_2 = arith.constant 0 : index
    %1 = vector.load %arg2[%c0_1, %c0_2] : memref<128x128xbf16, #tpu.memory_space<vmem>>, vector<128x128xbf16>
    %cst = arith.constant dense<0.000000e+00> : vector<128x128xf32>
    %2 = tpu.matmul %0, %1, %cst {dimension_numbers = #tpu.dot_dimension_numbers<[1], [0], [0], [1], [0, 0, 1, 1], [], []>} : vector<128x128xbf16>, vector<128x128xbf16>, vector<128x128xf32> -> vector<128x128xf32>
    %cst_3 = arith.constant dense<0.000000e+00> : vector<128xf32>
    %3 = vector.multi_reduction <add>, %2, %cst_3 [1] : vector<128x128xf32> to vector<128xf32>
    %4 = vector.shape_cast %3 : vector<128xf32> to vector<128x1xf32>
    %cst_4 = arith.constant 3.125000e-02 : f32
    %5 = vector.broadcast %cst_4 : f32 to vector<128x1xf32>
    %6 = arith.mulf %4, %5 : vector<128x1xf32>
    %7 = vector.broadcast %6 : vector<128x1xf32> to vector<128x128xf32>
    %8 = arith.subf %2, %7 : vector<128x128xf32>
    %9 = tpu.iota {dimensions = array<i32: 1>} : vector<1x128xi32>
    %c32_i32 = arith.constant 32 : i32
    %10 = vector.broadcast %c32_i32 : i32 to vector<1x128xi32>
    %11 = arith.cmpi slt, %9, %10 : vector<1x128xi32>
    %cst_5 = arith.constant 0.000000e+00 : f32
    %12 = vector.shape_cast %11 : vector<1x128xi1> to vector<1x128xi1>
    %13 = vector.broadcast %12 : vector<1x128xi1> to vector<128x128xi1>
    %14 = vector.broadcast %cst_5 : f32 to vector<128x128xf32>
    %15 = arith.select %13, %8, %14 : vector<128x128xi1>, vector<128x128xf32>
    %16 = arith.mulf %15, %15 : vector<128x128xf32>
    %cst_6 = arith.constant dense<0.000000e+00> : vector<128xf32>
    %17 = vector.multi_reduction <add>, %16, %cst_6 [1] : vector<128x128xf32> to vector<128xf32>
    %18 = vector.shape_cast %17 : vector<128xf32> to vector<128x1xf32>
    %cst_7 = arith.constant 3.125000e-02 : f32
    %19 = vector.broadcast %cst_7 : f32 to vector<128x1xf32>
    %20 = arith.mulf %18, %19 : vector<128x1xf32>
    %cst_8 = arith.constant 9.99999974E-6 : f32
    %21 = vector.broadcast %cst_8 : f32 to vector<128x1xf32>
    %22 = arith.addf %20, %21 : vector<128x1xf32>
    %23 = math.rsqrt %22 : vector<128x1xf32>
    %24 = vector.broadcast %23 : vector<128x1xf32> to vector<128x128xf32>
    %25 = arith.mulf %15, %24 : vector<128x128xf32>
    %c0_9 = arith.constant 0 : index
    %c0_10 = arith.constant 0 : index
    %26 = vector.load %arg3[%c0_9, %c0_10] : memref<1x128xf32, #tpu.memory_space<vmem>>, vector<1x128xf32>
    %27 = vector.broadcast %26 : vector<1x128xf32> to vector<128x128xf32>
    %28 = arith.mulf %25, %27 : vector<128x128xf32>
    %c0_11 = arith.constant 0 : index
    %c0_12 = arith.constant 0 : index
    %29 = vector.load %arg4[%c0_11, %c0_12] : memref<1x128xf32, #tpu.memory_space<vmem>>, vector<1x128xf32>
    %30 = vector.broadcast %29 : vector<1x128xf32> to vector<128x128xf32>
    %31 = arith.addf %28, %30 : vector<128x128xf32>
    %cst_13 = arith.constant 0.000000e+00 : f32
    %32 = vector.broadcast %cst_13 : f32 to vector<128x128xf32>
    %33 = arith.maximumf %31, %32 : vector<128x128xf32>
    %34 = arith.truncf %33 : vector<128x128xf32> to vector<128x128xbf16>
    %c0_14 = arith.constant 0 : index
    %c0_15 = arith.constant 0 : index
    %35 = vector.load %arg5[%c0_14, %c0_15] : memref<128x128xbf16, #tpu.memory_space<vmem>>, vector<128x128xbf16>
    tpu.vector_store %arg5[%c0_14, %c0_15], %34 {strides = array<i32>} : memref<128x128xbf16, #tpu.memory_space<vmem>>, vector<128x128xbf16>,
    return
  }
  func.func @transform_0(%arg0: i32) -> (i32, i32) {
    %c0_i32 = arith.constant 0 : i32
    %c0_i32_0 = arith.constant 0 : i32
    return %arg0, %c0_i32 : i32, i32
  }
  func.func @transform_1(%arg0: i32) -> (i32, i32) {
    %c0_i32 = arith.constant 0 : i32
    %c0_i32_0 = arith.constant 0 : i32
    %c0_i32_1 = arith.constant 0 : i32
    return %c0_i32, %c0_i32_0 : i32, i32
  }
  func.func @transform_2(%arg0: i32) -> (i32, i32) {
    %c0_i32 = arith.constant 0 : i32
    %c0_i32_0 = arith.constant 0 : i32
    %c0_i32_1 = arith.constant 0 : i32
    return %c0_i32, %c0_i32_0 : i32, i32
  }
  func.func @transform_3(%arg0: i32) -> (i32, i32) {
    %c0_i32 = arith.constant 0 : i32
    %c0_i32_0 = arith.constant 0 : i32
    %c0_i32_1 = arith.constant 0 : i32
    return %c0_i32, %c0_i32_0 : i32, i32
  }
  func.func @transform_4(%arg0: i32) -> (i32, i32) {
    %c0_i32 = arith.constant 0 : i32
    %c0_i32_0 = arith.constant 0 : i32
    return %arg0, %c0_i32 : i32, i32
  }
}

module attributes {stable_mosaic.version = 11 : i64} {
  func.func @_scatter_sum_kernel(%arg0: i32, %arg1: i32, %arg2: memref<1x128xi32, #tpu.memory_space<vmem>>, %arg3: memref<128x128xbf16, #tpu.memory_space<vmem>>, %arg4: memref<16x128xbf16, #tpu.memory_space<vmem>>, %arg5: memref<16x128xf32, #tpu.memory_space<vmem>>) attributes {dimension_semantics = [#tpu.dimension_semantics<parallel>, #tpu.dimension_semantics<arbitrary>], iteration_bounds = array<i64: 1, 1>, scalar_prefetch = 0 : i64, scratch_operands = 1 : i64, tpu.core_type = #tpu.core_type<tc>, window_params = [{transform_indices = @transform_0, window_bounds = array<i64: 1, 128>}, {transform_indices = @transform_1, window_bounds = array<i64: 128, 128>}, {transform_indices = @transform_2, window_bounds = array<i64: 16, 128>}]} {
    %c0_i32 = arith.constant 0 : i32
    %0 = arith.cmpi eq, %arg1, %c0_i32 : i32
    %1 = arith.extui %0 : i1 to i32
    %c0_i32_0 = arith.constant 0 : i32
    %2 = arith.cmpi ne, %1, %c0_i32_0 : i32
    scf.if %2 {
      %cst_10 = arith.constant 0.000000e+00 : f32
      %21 = vector.broadcast %cst_10 : f32 to vector<16x128xf32>
      %c0_11 = arith.constant 0 : index
      %c0_12 = arith.constant 0 : index
      %22 = vector.load %arg5[%c0_11, %c0_12] : memref<16x128xf32, #tpu.memory_space<vmem>>, vector<16x128xf32>
      tpu.vector_store %arg5[%c0_11, %c0_12], %21 {strides = array<i32>} : memref<16x128xf32, #tpu.memory_space<vmem>>, vector<16x128xf32>,
    } else {
    }
    %c16_i32 = arith.constant 16 : i32
    %3 = arith.muli %arg0, %c16_i32 : i32
    %4 = tpu.iota {dimensions = array<i32: 0>} : vector<16x128xi32>
    %5 = vector.broadcast %3 : i32 to vector<16x128xi32>
    %6 = arith.addi %5, %4 : vector<16x128xi32>
    %c0 = arith.constant 0 : index
    %c0_1 = arith.constant 0 : index
    %7 = vector.load %arg2[%c0, %c0_1] : memref<1x128xi32, #tpu.memory_space<vmem>>, vector<1x128xi32>
    %8 = vector.broadcast %7 : vector<1x128xi32> to vector<16x128xi32>
    %9 = arith.cmpi eq, %6, %8 : vector<16x128xi32>
    %10 = arith.extui %9 : vector<16x128xi1> to vector<16x128xi32>
    %11 = arith.sitofp %10 : vector<16x128xi32> to vector<16x128xf32>
    %12 = arith.truncf %11 : vector<16x128xf32> to vector<16x128xbf16>
    %c0_2 = arith.constant 0 : index
    %c0_3 = arith.constant 0 : index
    %13 = vector.load %arg5[%c0_2, %c0_3] : memref<16x128xf32, #tpu.memory_space<vmem>>, vector<16x128xf32>
    %c0_4 = arith.constant 0 : index
    %c0_5 = arith.constant 0 : index
    %14 = vector.load %arg3[%c0_4, %c0_5] : memref<128x128xbf16, #tpu.memory_space<vmem>>, vector<128x128xbf16>
    %cst = arith.constant dense<0.000000e+00> : vector<16x128xf32>
    %15 = tpu.matmul %12, %14, %cst {dimension_numbers = #tpu.dot_dimension_numbers<[1], [0], [0], [1], [0, 0, 1, 1], [], []>} : vector<16x128xbf16>, vector<128x128xbf16>, vector<16x128xf32> -> vector<16x128xf32>
    %16 = arith.addf %13, %15 : vector<16x128xf32>
    %c0_6 = arith.constant 0 : index
    %c0_7 = arith.constant 0 : index
    %17 = vector.load %arg5[%c0_6, %c0_7] : memref<16x128xf32, #tpu.memory_space<vmem>>, vector<16x128xf32>
    tpu.vector_store %arg5[%c0_6, %c0_7], %16 {strides = array<i32>} : memref<16x128xf32, #tpu.memory_space<vmem>>, vector<16x128xf32>,
    %c0_i32_8 = arith.constant 0 : i32
    %18 = arith.cmpi eq, %arg1, %c0_i32_8 : i32
    %19 = arith.extui %18 : i1 to i32
    %c0_i32_9 = arith.constant 0 : i32
    %20 = arith.cmpi ne, %19, %c0_i32_9 : i32
    scf.if %20 {
      %c0_10 = arith.constant 0 : index
      %c0_11 = arith.constant 0 : index
      %21 = vector.load %arg5[%c0_10, %c0_11] : memref<16x128xf32, #tpu.memory_space<vmem>>, vector<16x128xf32>
      %22 = arith.truncf %21 : vector<16x128xf32> to vector<16x128xbf16>
      %c0_12 = arith.constant 0 : index
      %c0_13 = arith.constant 0 : index
      %23 = vector.load %arg4[%c0_12, %c0_13] : memref<16x128xbf16, #tpu.memory_space<vmem>>, vector<16x128xbf16>
      tpu.vector_store %arg4[%c0_12, %c0_13], %22 {strides = array<i32>} : memref<16x128xbf16, #tpu.memory_space<vmem>>, vector<16x128xbf16>,
    } else {
    }
    return
  }
  func.func @transform_0(%arg0: i32, %arg1: i32) -> (i32, i32) {
    %c0_i32 = arith.constant 0 : i32
    %c0_i32_0 = arith.constant 0 : i32
    return %c0_i32, %arg1 : i32, i32
  }
  func.func @transform_1(%arg0: i32, %arg1: i32) -> (i32, i32) {
    %c0_i32 = arith.constant 0 : i32
    %c0_i32_0 = arith.constant 0 : i32
    return %arg1, %c0_i32 : i32, i32
  }
  func.func @transform_2(%arg0: i32, %arg1: i32) -> (i32, i32) {
    %c0_i32 = arith.constant 0 : i32
    %c0_i32_0 = arith.constant 0 : i32
    return %arg0, %c0_i32 : i32, i32
  }
}

module attributes {stable_mosaic.version = 11 : i64} {
  func.func @_fused_kernel(%arg0: i32, %arg1: memref<16x32xbf16, #tpu.memory_space<vmem>>, %arg2: memref<16x128xbf16, #tpu.memory_space<vmem>>, %arg3: memref<32x128xbf16, #tpu.memory_space<vmem>>, %arg4: memref<128x128xbf16, #tpu.memory_space<vmem>>, %arg5: memref<1x128xf32, #tpu.memory_space<vmem>>, %arg6: memref<1x128xf32, #tpu.memory_space<vmem>>, %arg7: memref<16x128xf32, #tpu.memory_space<vmem>>, %arg8: memref<16x128xf32, #tpu.memory_space<vmem>>) attributes {dimension_semantics = [#tpu.dimension_semantics<parallel>], iteration_bounds = array<i64: 1>, scalar_prefetch = 0 : i64, scratch_operands = 0 : i64, tpu.core_type = #tpu.core_type<tc>, window_params = [{transform_indices = @transform_0, window_bounds = array<i64: 16, 32>}, {transform_indices = @transform_1, window_bounds = array<i64: 16, 128>}, {pipeline_mode = #tpu.pipeline_mode<synchronous>, transform_indices = @transform_2, window_bounds = array<i64: 32, 128>}, {pipeline_mode = #tpu.pipeline_mode<synchronous>, transform_indices = @transform_3, window_bounds = array<i64: 128, 128>}, {pipeline_mode = #tpu.pipeline_mode<synchronous>, transform_indices = @transform_4, window_bounds = array<i64: 1, 128>}, {pipeline_mode = #tpu.pipeline_mode<synchronous>, transform_indices = @transform_5, window_bounds = array<i64: 1, 128>}, {transform_indices = @transform_6, window_bounds = array<i64: 16, 128>}, {transform_indices = @transform_7, window_bounds = array<i64: 16, 128>}]} {
    %c0 = arith.constant 0 : index
    %c0_0 = arith.constant 0 : index
    %0 = vector.load %arg1[%c0, %c0_0] : memref<16x32xbf16, #tpu.memory_space<vmem>>, vector<16x32xbf16>
    %c0_1 = arith.constant 0 : index
    %c0_2 = arith.constant 0 : index
    %1 = vector.load %arg3[%c0_1, %c0_2] : memref<32x128xbf16, #tpu.memory_space<vmem>>, vector<32x128xbf16>
    %cst = arith.constant dense<0.000000e+00> : vector<16x128xf32>
    %2 = tpu.matmul %0, %1, %cst {dimension_numbers = #tpu.dot_dimension_numbers<[1], [0], [0], [1], [0, 0, 1, 1], [], []>} : vector<16x32xbf16>, vector<32x128xbf16>, vector<16x128xf32> -> vector<16x128xf32>
    %c0_3 = arith.constant 0 : index
    %c0_4 = arith.constant 0 : index
    %3 = vector.load %arg2[%c0_3, %c0_4] : memref<16x128xbf16, #tpu.memory_space<vmem>>, vector<16x128xbf16>
    %c0_5 = arith.constant 0 : index
    %c0_6 = arith.constant 0 : index
    %4 = vector.load %arg4[%c0_5, %c0_6] : memref<128x128xbf16, #tpu.memory_space<vmem>>, vector<128x128xbf16>
    %cst_7 = arith.constant dense<0.000000e+00> : vector<16x128xf32>
    %5 = tpu.matmul %3, %4, %cst_7 {dimension_numbers = #tpu.dot_dimension_numbers<[1], [0], [0], [1], [0, 0, 1, 1], [], []>} : vector<16x128xbf16>, vector<128x128xbf16>, vector<16x128xf32> -> vector<16x128xf32>
    %6 = arith.addf %2, %5 : vector<16x128xf32>
    %cst_8 = arith.constant dense<0.000000e+00> : vector<16xf32>
    %7 = vector.multi_reduction <add>, %6, %cst_8 [1] : vector<16x128xf32> to vector<16xf32>
    %8 = vector.shape_cast %7 : vector<16xf32> to vector<16x1xf32>
    %cst_9 = arith.constant 3.125000e-02 : f32
    %9 = vector.broadcast %cst_9 : f32 to vector<16x1xf32>
    %10 = arith.mulf %8, %9 : vector<16x1xf32>
    %11 = vector.broadcast %10 : vector<16x1xf32> to vector<16x128xf32>
    %12 = arith.subf %6, %11 : vector<16x128xf32>
    %13 = tpu.iota {dimensions = array<i32: 1>} : vector<1x128xi32>
    %c32_i32 = arith.constant 32 : i32
    %14 = vector.broadcast %c32_i32 : i32 to vector<1x128xi32>
    %15 = arith.cmpi slt, %13, %14 : vector<1x128xi32>
    %cst_10 = arith.constant 0.000000e+00 : f32
    %16 = vector.shape_cast %15 : vector<1x128xi1> to vector<1x128xi1>
    %17 = vector.broadcast %16 : vector<1x128xi1> to vector<16x128xi1>
    %18 = vector.broadcast %cst_10 : f32 to vector<16x128xf32>
    %19 = arith.select %17, %12, %18 : vector<16x128xi1>, vector<16x128xf32>
    %20 = arith.mulf %19, %19 : vector<16x128xf32>
    %cst_11 = arith.constant dense<0.000000e+00> : vector<16xf32>
    %21 = vector.multi_reduction <add>, %20, %cst_11 [1] : vector<16x128xf32> to vector<16xf32>
    %22 = vector.shape_cast %21 : vector<16xf32> to vector<16x1xf32>
    %cst_12 = arith.constant 3.125000e-02 : f32
    %23 = vector.broadcast %cst_12 : f32 to vector<16x1xf32>
    %24 = arith.mulf %22, %23 : vector<16x1xf32>
    %cst_13 = arith.constant 9.99999974E-6 : f32
    %25 = vector.broadcast %cst_13 : f32 to vector<16x1xf32>
    %26 = arith.addf %24, %25 : vector<16x1xf32>
    %27 = math.rsqrt %26 : vector<16x1xf32>
    %28 = vector.broadcast %27 : vector<16x1xf32> to vector<16x128xf32>
    %29 = arith.mulf %19, %28 : vector<16x128xf32>
    %c0_14 = arith.constant 0 : index
    %c0_15 = arith.constant 0 : index
    %30 = vector.load %arg5[%c0_14, %c0_15] : memref<1x128xf32, #tpu.memory_space<vmem>>, vector<1x128xf32>
    %31 = vector.broadcast %30 : vector<1x128xf32> to vector<16x128xf32>
    %32 = arith.mulf %29, %31 : vector<16x128xf32>
    %c0_16 = arith.constant 0 : index
    %c0_17 = arith.constant 0 : index
    %33 = vector.load %arg6[%c0_16, %c0_17] : memref<1x128xf32, #tpu.memory_space<vmem>>, vector<1x128xf32>
    %34 = vector.broadcast %33 : vector<1x128xf32> to vector<16x128xf32>
    %35 = arith.addf %32, %34 : vector<16x128xf32>
    %cst_18 = arith.constant 0.000000e+00 : f32
    %36 = vector.broadcast %cst_18 : f32 to vector<16x128xf32>
    %37 = arith.maximumf %35, %36 : vector<16x128xf32>
    %c0_19 = arith.constant 0 : index
    %c0_20 = arith.constant 0 : index
    %38 = vector.load %arg7[%c0_19, %c0_20] : memref<16x128xf32, #tpu.memory_space<vmem>>, vector<16x128xf32>
    %39 = arith.addf %37, %38 : vector<16x128xf32>
    %c0_21 = arith.constant 0 : index
    %c0_22 = arith.constant 0 : index
    %40 = vector.load %arg8[%c0_21, %c0_22] : memref<16x128xf32, #tpu.memory_space<vmem>>, vector<16x128xf32>
    tpu.vector_store %arg8[%c0_21, %c0_22], %39 {strides = array<i32>} : memref<16x128xf32, #tpu.memory_space<vmem>>, vector<16x128xf32>,
    return
  }
  func.func @transform_0(%arg0: i32) -> (i32, i32) {
    %c0_i32 = arith.constant 0 : i32
    %c0_i32_0 = arith.constant 0 : i32
    return %arg0, %c0_i32 : i32, i32
  }
  func.func @transform_1(%arg0: i32) -> (i32, i32) {
    %c0_i32 = arith.constant 0 : i32
    %c0_i32_0 = arith.constant 0 : i32
    return %arg0, %c0_i32 : i32, i32
  }
  func.func @transform_2(%arg0: i32) -> (i32, i32) {
    %c0_i32 = arith.constant 0 : i32
    %c0_i32_0 = arith.constant 0 : i32
    %c0_i32_1 = arith.constant 0 : i32
    return %c0_i32, %c0_i32_0 : i32, i32
  }
  func.func @transform_3(%arg0: i32) -> (i32, i32) {
    %c0_i32 = arith.constant 0 : i32
    %c0_i32_0 = arith.constant 0 : i32
    %c0_i32_1 = arith.constant 0 : i32
    return %c0_i32, %c0_i32_0 : i32, i32
  }
  func.func @transform_4(%arg0: i32) -> (i32, i32) {
    %c0_i32 = arith.constant 0 : i32
    %c0_i32_0 = arith.constant 0 : i32
    %c0_i32_1 = arith.constant 0 : i32
    return %c0_i32, %c0_i32_0 : i32, i32
  }
  func.func @transform_5(%arg0: i32) -> (i32, i32) {
    %c0_i32 = arith.constant 0 : i32
    %c0_i32_0 = arith.constant 0 : i32
    %c0_i32_1 = arith.constant 0 : i32
    return %c0_i32, %c0_i32_0 : i32, i32
  }
  func.func @transform_6(%arg0: i32) -> (i32, i32) {
    %c0_i32 = arith.constant 0 : i32
    %c0_i32_0 = arith.constant 0 : i32
    return %arg0, %c0_i32 : i32, i32
  }
  func.func @transform_7(%arg0: i32) -> (i32, i32) {
    %c0_i32 = arith.constant 0 : i32
    %c0_i32_0 = arith.constant 0 : i32
    return %arg0, %c0_i32 : i32, i32
  }
}

</mosaic_0001>

<bundles_post_ra>
// kernel: gnn_layer_forward.5
= control target key start
LH: loop header
LB: loop body
LE: loop exit
PB: predicated region body
PF: predicated region fallthrough
CT: control target
= control target key end

     0   :  { %v382_v1 = vmov 0.0   ;;  %vm383_vm0 = vmmov 0   ;;  %vm164_vm1 = vcmask 261120   ;;  %s487_s0 = inlined_call_operand.vmem [shape: bf16[16,32], index: 0, kind: input, shape index: {}]   ;;  %s488_s1 = inlined_call_operand.vmem [shape: bf16[16,128], index: 1, kind: input, shape index: {}]   ;;  %s489_s2 = inlined_call_operand.vmem [shape: bf16[32,128], index: 2, kind: input, shape index: {}]   ;;  %s490_s3 = inlined_call_operand.vmem [shape: bf16[128,128], index: 3, kind: input, shape index: {}]   ;;  %s491_s4 = inlined_call_operand.vmem [shape: f32[1,128], index: 4, kind: input, shape index: {}]   ;;  %s492_s5 = inlined_call_operand.vmem [shape: f32[1,128], index: 5, kind: input, shape index: {}]   ;;  %s493_s6 = inlined_call_operand.vmem [shape: f32[16,128], index: 6, kind: input, shape index: {}]   ;;  %s494_s7 = inlined_call_operand.hbm [shape: f32[16,128], index: 7, kind: output, shape index: {}]  }
   0x1   :  { %v342_v0 = vld [vmem:[%s490_s3] sm:$0xff]   ;;  %307 = vmatprep.subr.bf16.mxu1 %v382_v1  ;;  %327 = vmatprep.subr.bf16.mxu0 %v382_v1  ;;  %v343_v2 = vld [vmem:[%s490_s3 + $0x8] sm:$0xff]   ;;  %v344_v3 = vld [vmem:[%s490_s3 + $0x10] sm:$0xff]  }
   0x2   :  { %308 = vmatpush3.bf16.msra.mxu1 %v342_v0  ;;  %331 = vmatprep.mubr.msk.bf16.mxu0 %vm383_vm0, %v382_v1  ;;  %v348_v4 = vld [vmem:[%s489_s2] sm:$0xff]   ;;  %v350_v5 = vld [vmem:[%s489_s2 + $0x8] sm:$0xff]   ;;  %v345_v6 = vld [vmem:[%s490_s3 + $0x18] sm:$0xff]  }
   0x3   :  { %309 = vmatprep.subr.bf16.mxu1 %v382_v1  ;;  %323 = vmatprep.mubr.msk.bf16.mxu1 %vm383_vm0, %v382_v1  ;;  %v352_v7 = vld [vmem:[%s487_s0] sm:$0xff]  }
   0x4   :  { %328 = vmatpush3.bf16.msra.mxu0 %v348_v4 }
   0x5   :  { %329 = vmatprep.subr.bf16.mxu0 %v382_v1 }
   0x6   :  { %310 = vmatpush3.bf16.msra.mxu1 %v343_v2 }
   0x7   :  { %311 = vmatprep.subr.bf16.mxu1 %v382_v1 }
   0x8   :  { %330 = vmatpush3.bf16.msra.mxu0 %v350_v5 }
   0xa   :  { %312 = vmatpush3.bf16.msra.mxu1 %v344_v3 }
   0xb   :  { %313 = vmatprep.subr.bf16.mxu1 %v382_v1 }
   0xc   :  { %12 = vsyncpa [#allocation3], 0  ;;  %v346_v8 = vld [vmem:[%s490_s3 + $0x20] sm:$0xff]   ;;  %332 = vmatmul.mubr.msk.bf16.vlgmr.msra.gmra.mrb[0].mxu0 %vm164_vm1, %v352_v7  ;;  %v347_v9 = vld [vmem:[%s490_s3 + $0x28] sm:$0xff]   ;;  %v217_v23 = vlaneseq  ;;  %s384_s27 = smov [#allocation2]  }
   0xd   :  { %v349_v10 = vld [vmem:[%s490_s3 + $0x30] sm:$0xff]   ;;  %v351_v11 = vld [vmem:[%s490_s3 + $0x38] sm:$0xff]   ;;  %v353_v12 = vld [vmem:[%s488_s1] sm:$0xff]   ;;  %s269_s28 = sshll.u32 %s384_s27, 4  ;;  %s270_s28 = int_to_ptr.vmem [resolvable:$true] %s269_s28 }
   0xe   :  { %314 = vmatpush3.bf16.msra.mxu1 %v345_v6  ;;  %v218_v24 = vand.u32 127, %v217_v23  ;;  %v293_v42 = vld [vmem:[%s491_s4] ss:$0 sm:$0xff]  ;;  %v259_v54 = vld [vmem:[%s493_s6 + $0x8] sm:$0xff]  ;;  %p363_p1 = scmp.lt.s32.totalorder %s270_s28, %s270_s28 }
   0xf   :  { %315 = vmatprep.subr.bf16.mxu1 %v382_v1  ;;  %v294_v44 = vld [vmem:[%s492_s5] ss:$0 sm:$0xff]  ;;  %s358_s5 = scalar_lea.vmem %s270_s28, 256 }
  0x10   :  { %vm219_vm2 = vcmp.lt.s32.totalorder %v218_v24, 32  ;;  %v258_v49 = vld [vmem:[%s493_s6] sm:$0xff]  ;;  %p359_p0 = scmp.ne.s32.totalorder %s270_s28, %s358_s5  ;;  %p364_p2 = scmp.lt.s32.totalorder %s358_s5, %s358_s5 }
  0x12   :  { %316 = vmatpush3.bf16.msra.mxu1 %v346_v8  ;;  %p365_p3 = por %p364_p2, %p363_p1 }
  0x13   :  { %317 = vmatprep.subr.bf16.mxu1 %v382_v1 }
  0x14   :  { %p366_p4 = pnand %p365_p3, %p359_p0 }
  0x16   :  { %318 = vmatpush3.bf16.msra.mxu1 %v347_v9 }
  0x17   :  { %319 = vmatprep.subr.bf16.mxu1 %v382_v1 }
  0x1a   :  { %320 = vmatpush3.bf16.msra.mxu1 %v349_v10 }
  0x1b   :  { %321 = vmatprep.subr.bf16.mxu1 %v382_v1 }
  0x1e   :  { %322 = vmatpush3.bf16.msra.mxu1 %v351_v11 }
  0x21   :  { %324 = vmatmul.mubr.bf16.vlgmr.msra.gmra.mrb[0].mxu1 %v353_v12 }
  0xdf   :  { %v202_v13 = vpop.f32.mrb[0].mxu0 }
  0xe0   :  { %v333_v14 = vpop.f32.mrb[1].mxu0 }
  0xe1   :  { %v205_v15 = vpop.f32.mrb[2].mxu0 }
  0xe2   :  { %v334_v16 = vpop.f32.mrb[3].mxu0 }
  0xf4   :  { %v140_v17 = vpop.f32.mrb[0].mxu1 }
  0xf5   :  { %v203_v18 = vadd.f32 %v202_v13, %v140_v17  ;;  %v325_v19 = vpop.f32.mrb[1].mxu1 }
  0xf6   :  { %v143_v20 = vpop.f32.mrb[2].mxu1 }
  0xf7   :  { %v206_v21 = vadd.f32 %v205_v15, %v143_v20  ;;  %v326_v22 = vpop.f32.mrb[3].mxu1  ;;  %209 = vadd.xlane.f32.xlu0 %v203_v18 }
  0xfb   :  { %211 = vadd.xlane.f32.xlu0 %v206_v21 }
 0x184   :  { %v210_v25 = vpop.xlane.xlu0 %209 }
 0x185   :  { %v213_v26 = vmul.f32 0.03125, %v210_v25 }
 0x187   :  { %v215_v27 = vsub.f32 %v203_v18, %v213_v26 }
 0x188   :  { %v212_v28 = vpop.xlane.xlu0 %211 }
 0x189   :  { %v214_v29 = vmul.f32 0.03125, %v212_v28  ;;  %v222_v30 = vsel %vm219_vm2, %v215_v27, 0.0 }
 0x18a   :  { %v224_v31 = vmul.f32 %v222_v30, %v222_v30 }
 0x18b   :  { %v216_v32 = vsub.f32 %v206_v21, %v214_v29 }
 0x18c   :  { %226 = vadd.xlane.f32.xlu1 %v224_v31 }
 0x18d   :  { %v223_v33 = vsel %vm219_vm2, %v216_v32, 0.0 }
 0x18e   :  { %v225_v34 = vmul.f32 %v223_v33, %v223_v33 }
 0x190   :  { %228 = vadd.xlane.f32.xlu1 %v225_v34 }
 0x219   :  { %v227_v35 = vpop.xlane.xlu1 %226 }
 0x21a   :  { %v230_v36 = vmul.f32 0.03125, %v227_v35 }
 0x21c   :  { %v232_v37 = vadd.f32 1e-05, %v230_v36 }
 0x21d   :  { %v229_v38 = vpop.xlane.xlu1 %228 }
 0x21e   :  { %354 = vrsqrt.f32 %v232_v37  ;;  %v231_v39 = vmul.f32 0.03125, %v229_v38 }
 0x220   :  { %v233_v40 = vadd.f32 1e-05, %v231_v39 }
 0x222   :  { %356 = vrsqrt.f32 %v233_v40 }
 0x228   :  { %v355_v41 = vpop.eup %354 }
 0x229   :  { %v236_v43 = vmul.f32 %v355_v41, %v222_v30 }
 0x22b   :  { %v245_v45 = vmul.f32 %v293_v42, %v236_v43 }
 0x22c   :  { %v357_v46 = vpop.eup %356 }
 0x22d   :  { %v237_v47 = vmul.f32 %v357_v46, %v223_v33  ;;  %v254_v48 = vadd.f32 %v294_v44, %v245_v45 }
 0x22f   :  { %v246_v50 = vmul.f32 %v293_v42, %v237_v47  ;;  %v256_v51 = vmax.f32 %v254_v48, 0.0 }
 0x231   :  { %v255_v52 = vadd.f32 %v294_v44, %v246_v50  ;;  %v260_v53 = vadd.f32 %v258_v49, %v256_v51 }
 0x233   :  { %v257_v55 = vmax.f32 %v255_v52, 0.0  ;;  %262 = vst [vmem:[#allocation2] sm:$0xff] %v260_v53 }
 0x235   :  { %v261_v56 = vadd.f32 %v259_v54, %v257_v55 }
 0x237   :  { %263 = vst [vmem:[#allocation2 + $0x8] sm:$0xff] %v261_v56 }
 0x238   :  { %369 = shalt.err (!%p366_p4)
}
 0x239   :  { %s370_s9 = scalar_lea.hbm %s494_s7, 256 }
 0x23a   :  { %p371_p5 = scmp.ne.s32.totalorder %s494_s7, %s370_s9  ;;  %p374_p6 = scmp.lt.u32.totalorder %s370_s9, %s494_s7 }
 0x23c   :  { %p376_p7 = pnand %p374_p6, %p371_p5 }
 0x23e   :  { %379 = shalt.err (!%p376_p7)
}
 0x23f   :  { %s385_s13 = smov 128   ;;  %s386_s14 = smov 8  }
 0x240   :  { %275 = dma.vmem_to_hbm [thread:$0]  %s270_s28, 256, %s494_s7, [#allocation3], %s385_s13, %s385_s13, %s386_s14  }
 0x241   :  { %380 = dma.done.wait [#allocation3], 256  }
 0x242   :  { %381 = vsyncadd [#allocation3], 4294967040 }
 0x243   :  { %279 = vsyncpa [#allocation3], 1 }

// kernel: gnn_layer_forward.4
= control target key start
LH: loop header
LB: loop body
LE: loop exit
PB: predicated region body
PF: predicated region fallthrough
CT: control target
= control target key end

     0   :  { %v229_v0 = vmov 0.0   ;;  %vm230_vm0 = vmmov 0   ;;  %v19_v6 = vlaneseq  ;;  %v231_v13 = vmov 1.0|1.0   ;;  %s277_s1 = inlined_call_operand.vmem [shape: bf16[128,128], index: 1, kind: input, shape index: {}]   ;;  %s278_s0 = inlined_call_operand.vmem [shape: s32[1,128], index: 0, kind: input, shape index: {}]   ;;  %s279_s2 = inlined_call_operand.vmem [shape: bf16[16,128], index: 2, kind: output, shape index: {}]  }
   0x1   :  { %198 = vmatprep.subr.bf16.mxu0 %v229_v0  ;;  %v221_v1 = vld [vmem:[%s277_s1] sm:$0xff]   ;;  %214 = vmatprep.mubr.msk.bf16.mxu0 %vm230_vm0, %v229_v0  ;;  %v222_v2 = vld [vmem:[%s277_s1 + $0x8] sm:$0xff]   ;;  %v223_v3 = vld [vmem:[%s277_s1 + $0x10] sm:$0xff]  }
   0x2   :  { %199 = vmatpush3.bf16.msra.mxu0 %v221_v1  ;;  %v224_v4 = vld [vmem:[%s277_s1 + $0x18] sm:$0xff]   ;;  %v225_v5 = vld [vmem:[%s277_s1 + $0x20] sm:$0xff]   ;;  %v226_v7 = vld [vmem:[%s277_s1 + $0x28] sm:$0xff]   ;;  %v20_v8 = vshrl.u32 %v19_v6, 7 }
   0x3   :  { %200 = vmatprep.subr.bf16.mxu0 %v229_v0  ;;  %v227_v9 = vld [vmem:[%s277_s1 + $0x30] sm:$0xff]   ;;  %v167_v11 = vld [vmem:[%s278_s0] ss:$0 sm:$0xff]  ;;  %v228_v12 = vld [vmem:[%s277_s1 + $0x38] sm:$0xff]  }
   0x4   :  { %v21_v10 = vadd.s32 8, %v20_v8  ;;  %vm30_vm1 = vcmp.eq.s32.totalorder %v20_v8, %v167_v11 }
   0x6   :  { %201 = vmatpush3.bf16.msra.mxu0 %v222_v2  ;;  %vm31_vm2 = vcmp.eq.s32.totalorder %v21_v10, %v167_v11 }
   0x7   :  { %202 = vmatprep.subr.bf16.mxu0 %v229_v0  ;;  %vm178_vm3 = vmpackc.low %vm31_vm2, %vm30_vm1 }
   0xa   :  { %203 = vmatpush3.bf16.msra.mxu0 %v223_v3 }
   0xb   :  { %204 = vmatprep.subr.bf16.mxu0 %v229_v0 }
   0xe   :  { %205 = vmatpush3.bf16.msra.mxu0 %v224_v4 }
   0xf   :  { %206 = vmatprep.subr.bf16.mxu0 %v229_v0 }
  0x12   :  { %207 = vmatpush3.bf16.msra.mxu0 %v225_v5 }
  0x13   :  { %208 = vmatprep.subr.bf16.mxu0 %v229_v0 }
  0x16   :  { %209 = vmatpush3.bf16.msra.mxu0 %v226_v7 }
  0x17   :  { %210 = vmatprep.subr.bf16.mxu0 %v229_v0 }
  0x1a   :  { %211 = vmatpush3.bf16.msra.mxu0 %v227_v9 }
  0x1b   :  { %212 = vmatprep.subr.bf16.mxu0 %v229_v0 }
  0x1e   :  { %213 = vmatpush3.bf16.msra.mxu0 %v228_v12 }
  0x21   :  { %215 = vmatmul.mubr.msk.bf16.vlgmr.msra.gmra.mrb[0].mxu0 %vm178_vm3, %v231_v13 }
  0xf4   :  { %v137_v14 = vpop.f32.mrb[0].mxu0 }
  0xf5   :  { %v216_v15 = vpop.f32.mrb[1].mxu0 }
  0xf6   :  { %v140_v16 = vpop.f32.mrb[2].mxu0 }
  0xf7   :  { %v187_v17 = vpack.c.bf16 %v140_v16, %v137_v14  ;;  %v217_v18 = vpop.f32.mrb[3].mxu0 }
  0xf9   :  { %188 = vst [vmem:[%s279_s2] sm:$0xff] %v187_v17  }

// kernel: gnn_layer_forward.3
= control target key start
LH: loop header
LB: loop body
LE: loop exit
PB: predicated region body
PF: predicated region fallthrough
CT: control target
= control target key end

     0   :  { %v307_v32 = vlaneseq  ;;  %s1093_s1 = inlined_call_operand.vmem [shape: bf16[128,128], index: 1, kind: input, shape index: {}]   ;;  %s1094_s0 = inlined_call_operand.vmem [shape: bf16[128,128], index: 0, kind: input, shape index: {}]   ;;  %s1095_s2 = inlined_call_operand.vmem [shape: f32[1,128], index: 2, kind: input, shape index: {}]   ;;  %s1096_s3 = inlined_call_operand.vmem [shape: f32[1,128], index: 3, kind: input, shape index: {}]   ;;  %s1097_s4 = inlined_call_operand.vmem [shape: bf16[128,128], index: 4, kind: output, shape index: {}]  }
   0x1   :  { %v747_v0 = vld [vmem:[%s1093_s1] sm:$0xff]   ;;  %v748_v1 = vld [vmem:[%s1093_s1 + $0x8] sm:$0xff]   ;;  %v749_v2 = vld [vmem:[%s1093_s1 + $0x10] sm:$0xff]  }
   0x2   :  { %699 = vmatprep.subr.bf16.mxu0 %v747_v0  ;;  %731 = vmatprep.subr.bf16.mxu1 %v747_v0  ;;  %v750_v3 = vld [vmem:[%s1093_s1 + $0x18] sm:$0xff]   ;;  %v755_v4 = vld [vmem:[%s1094_s0] sm:$0xff]   ;;  %v752_v7 = vld [vmem:[%s1093_s1 + $0x28] sm:$0xff]   ;;  %v901_v33 = vand.u32 127, %v307_v32 }
   0x3   :  { %700 = vmatpush3.bf16.msra.mxu0 %v747_v0  ;;  %739 = vmatpush3.bf16.msra.mxu1 %v747_v0  ;;  %v756_v5 = vld [vmem:[%s1094_s0 + $0x20] sm:$0xff]   ;;  %v753_v8 = vld [vmem:[%s1093_s1 + $0x30] sm:$0xff]   ;;  %v754_v9 = vld [vmem:[%s1093_s1 + $0x38] sm:$0xff]  }
   0x4   :  { %701 = vmatprep.subr.bf16.mxu0 %v748_v1  ;;  %732 = vmatprep.subr.bf16.mxu1 %v748_v1  ;;  %v751_v6 = vld [vmem:[%s1093_s1 + $0x20] sm:$0xff]   ;;  %v757_v10 = vld [vmem:[%s1094_s0 + $0x8] sm:$0xff]   ;;  %v759_v12 = vld [vmem:[%s1094_s0 + $0x10] sm:$0xff]   ;;  %vm309_vm0 = vcmp.lt.s32.totalorder %v901_v33, 32 }
   0x5   :  { %715 = vmatprep.mubr.bf16.mxu0 %v755_v4  ;;  %723 = vmatprep.mubr.bf16.mxu1 %v756_v5  ;;  %v758_v11 = vld [vmem:[%s1094_s0 + $0x28] sm:$0xff]   ;;  %v761_v13 = vld [vmem:[%s1094_s0 + $0x30] sm:$0xff]   ;;  %v760_v14 = vld [vmem:[%s1094_s0 + $0x18] sm:$0xff]  }
   0x6   :  { %v762_v15 = vld [vmem:[%s1094_s0 + $0x38] sm:$0xff]  }
   0x7   :  { %702 = vmatpush3.bf16.msra.mxu0 %v748_v1  ;;  %740 = vmatpush3.bf16.msra.mxu1 %v748_v1 }
   0x8   :  { %703 = vmatprep.subr.bf16.mxu0 %v749_v2  ;;  %733 = vmatprep.subr.bf16.mxu1 %v749_v2 }
   0xb   :  { %704 = vmatpush3.bf16.msra.mxu0 %v749_v2  ;;  %741 = vmatpush3.bf16.msra.mxu1 %v749_v2 }
   0xc   :  { %705 = vmatprep.subr.bf16.mxu0 %v750_v3  ;;  %734 = vmatprep.subr.bf16.mxu1 %v750_v3 }
   0xf   :  { %706 = vmatpush3.bf16.msra.mxu0 %v750_v3  ;;  %742 = vmatpush3.bf16.msra.mxu1 %v750_v3 }
  0x10   :  { %707 = vmatprep.subr.bf16.mxu0 %v751_v6  ;;  %735 = vmatprep.subr.bf16.mxu1 %v751_v6 }
  0x13   :  { %708 = vmatpush3.bf16.msra.mxu0 %v751_v6  ;;  %743 = vmatpush3.bf16.msra.mxu1 %v751_v6 }
  0x14   :  { %709 = vmatprep.subr.bf16.mxu0 %v752_v7  ;;  %736 = vmatprep.subr.bf16.mxu1 %v752_v7 }
  0x17   :  { %710 = vmatpush3.bf16.msra.mxu0 %v752_v7  ;;  %744 = vmatpush3.bf16.msra.mxu1 %v752_v7 }
  0x18   :  { %711 = vmatprep.subr.bf16.mxu0 %v753_v8  ;;  %737 = vmatprep.subr.bf16.mxu1 %v753_v8 }
  0x1b   :  { %712 = vmatpush3.bf16.msra.mxu0 %v753_v8  ;;  %745 = vmatpush3.bf16.msra.mxu1 %v753_v8 }
  0x1c   :  { %713 = vmatprep.subr.bf16.mxu0 %v754_v9  ;;  %738 = vmatprep.subr.bf16.mxu1 %v754_v9 }
  0x1f   :  { %714 = vmatpush3.bf16.msra.mxu0 %v754_v9  ;;  %746 = vmatpush3.bf16.msra.mxu1 %v754_v9 }
  0x22   :  { %716 = vmatmul.mubr.bf16.vlgmr.msra.gmra.mrb[0].mxu0 %v757_v10  ;;  %724 = vmatmul.mubr.bf16.vlgmr.msra.gmra.mrb[0].mxu1 %v758_v11 }
  0x23   :  { %719 = vmatprep.mubr.bf16.mxu0 %v759_v12  ;;  %727 = vmatprep.mubr.bf16.mxu1 %v761_v13 }
  0x2a   :  { %720 = vmatmul.mubr.bf16.gmra.mrb[4].mxu0 %v760_v14  ;;  %728 = vmatmul.mubr.bf16.gmra.mrb[4].mxu1 %v762_v15 }
  0xf5   :  { %v717_v16 = vpop.f32.mrb[0].mxu0  ;;  %v725_v17 = vpop.f32.mrb[0].mxu1 }
  0xf6   :  { %263 = vadd.xlane.f32.xlu0 %v725_v17  ;;  %v868_v18 = vpop.f32.mrb[1].mxu1  ;;  %247 = vadd.xlane.f32.xlu1 %v717_v16  ;;  %v180_v19 = vpop.f32.mrb[1].mxu0 }
  0xf7   :  { %v718_v20 = vpop.f32.mrb[2].mxu0  ;;  %v726_v21 = vpop.f32.mrb[2].mxu1 }
  0xf8   :  { %v870_v22 = vpop.f32.mrb[3].mxu0  ;;  %v872_v23 = vpop.f32.mrb[3].mxu1 }
  0xfa   :  { %243 = vadd.xlane.f32.xlu0 %v180_v19  ;;  %249 = vadd.xlane.f32.xlu1 %v718_v20 }
  0xfd   :  { %v874_v24 = vpop.f32.mrb[4].mxu0  ;;  %v876_v25 = vpop.f32.mrb[4].mxu1 }
  0xfe   :  { %259 = vadd.xlane.f32.xlu0 %v868_v18  ;;  %265 = vadd.xlane.f32.xlu1 %v726_v21  ;;  %v879_v26 = vpop.f32.mrb[5].mxu0  ;;  %v881_v27 = vpop.f32.mrb[5].mxu1 }
  0xff   :  { %v883_v28 = vpop.f32.mrb[6].mxu0  ;;  %v885_v29 = vpop.f32.mrb[6].mxu1 }
 0x100   :  { %v887_v30 = vpop.f32.mrb[7].mxu0  ;;  %v889_v31 = vpop.f32.mrb[7].mxu1 }
 0x102   :  { %261 = vadd.xlane.f32.xlu1 %v872_v23  ;;  %245 = vadd.xlane.f32.xlu0 %v870_v22 }
 0x106   :  { %255 = vadd.xlane.f32.xlu0 %v874_v24  ;;  %257 = vadd.xlane.f32.xlu1 %v883_v28 }
 0x10a   :  { %251 = vadd.xlane.f32.xlu0 %v879_v26  ;;  %253 = vadd.xlane.f32.xlu1 %v887_v30 }
 0x10e   :  { %267 = vadd.xlane.f32.xlu0 %v881_v27  ;;  %269 = vadd.xlane.f32.xlu1 %v889_v31 }
 0x112   :  { %271 = vadd.xlane.f32.xlu0 %v876_v25  ;;  %273 = vadd.xlane.f32.xlu1 %v885_v29 }
 0x183   :  { %v264_v34 = vpop.xlane.xlu0 %263  ;;  %v248_v35 = vpop.xlane.xlu1 %247 }
 0x184   :  { %v285_v36 = vmul.f32 0.03125, %v264_v34  ;;  %v277_v37 = vmul.f32 0.03125, %v248_v35 }
 0x186   :  { %v301_v38 = vsub.f32 %v725_v17, %v285_v36  ;;  %v293_v39 = vsub.f32 %v717_v16, %v277_v37 }
 0x187   :  { %v244_v40 = vpop.xlane.xlu0 %243  ;;  %v250_v41 = vpop.xlane.xlu1 %249 }
 0x188   :  { %v275_v42 = vmul.f32 0.03125, %v244_v40  ;;  %v278_v43 = vmul.f32 0.03125, %v250_v41  ;;  %v906_v44 = vsel %vm309_vm0, %v293_v39, 0.0  ;;  %v912_v48 = vsel %vm309_vm0, %v301_v38, 0.0 }
 0x189   :  { %v330_v45 = vmul.f32 %v906_v44, %v906_v44  ;;  %v338_v54 = vmul.f32 %v912_v48, %v912_v48 }
 0x18a   :  { %v291_v46 = vsub.f32 %v180_v19, %v275_v42  ;;  %v294_v47 = vsub.f32 %v718_v20, %v278_v43 }
 0x18b   :  { %v260_v49 = vpop.xlane.xlu0 %259  ;;  %v266_v50 = vpop.xlane.xlu1 %265  ;;  %348 = vadd.xlane.f32.xlu0 %v330_v45 }
 0x18c   :  { %v283_v51 = vmul.f32 0.03125, %v260_v49  ;;  %v286_v52 = vmul.f32 0.03125, %v266_v50  ;;  %v916_v53 = vsel %vm309_vm0, %v294_v47, 0.0  ;;  %v925_v58 = vsel %vm309_vm0, %v291_v46, 0.0 }
 0x18d   :  { %v331_v55 = vmul.f32 %v916_v53, %v916_v53  ;;  %v328_v0 = vmul.f32 %v925_v58, %v925_v58 }
 0x18e   :  { %v299_v56 = vsub.f32 %v868_v18, %v283_v51  ;;  %v302_v57 = vsub.f32 %v726_v21, %v286_v52 }
 0x18f   :  { %v262_v59 = vpop.xlane.xlu1 %261  ;;  %v246_v60 = vpop.xlane.xlu0 %245  ;;  %364 = vadd.xlane.f32.xlu0 %v338_v54  ;;  %350 = vadd.xlane.f32.xlu1 %v331_v55 }
 0x190   :  { %v284_v61 = vmul.f32 0.03125, %v262_v59  ;;  %v276_v62 = vmul.f32 0.03125, %v246_v60  ;;  %v929_v63 = vsel %vm309_vm0, %v302_v57, 0.0  ;;  %v939_v4 = vsel %vm309_vm0, %v299_v56, 0.0 }
 0x191   :  { %v339_v1 = vmul.f32 %v929_v63, %v929_v63  ;;  %v336_v10 = vmul.f32 %v939_v4, %v939_v4 }
 0x192   :  { %v300_v2 = vsub.f32 %v872_v23, %v284_v61  ;;  %v292_v3 = vsub.f32 %v870_v22, %v276_v62 }
 0x193   :  { %v256_v5 = vpop.xlane.xlu0 %255  ;;  %344 = vadd.xlane.f32.xlu0 %v328_v0  ;;  %v258_v6 = vpop.xlane.xlu1 %257  ;;  %366 = vadd.xlane.f32.xlu1 %v339_v1 }
 0x194   :  { %v281_v7 = vmul.f32 0.03125, %v256_v5  ;;  %v282_v8 = vmul.f32 0.03125, %v258_v6  ;;  %v943_v9 = vsel %vm309_vm0, %v292_v3, 0.0  ;;  %v953_v14 = vsel %vm309_vm0, %v300_v2, 0.0 }
 0x195   :  { %v329_v11 = vmul.f32 %v943_v9, %v943_v9  ;;  %v337_v21 = vmul.f32 %v953_v14, %v953_v14 }
 0x196   :  { %v297_v12 = vsub.f32 %v874_v24, %v281_v7  ;;  %v298_v13 = vsub.f32 %v883_v28, %v282_v8 }
 0x197   :  { %360 = vadd.xlane.f32.xlu0 %v336_v10  ;;  %v252_v15 = vpop.xlane.xlu0 %251  ;;  %346 = vadd.xlane.f32.xlu1 %v329_v11  ;;  %v254_v16 = vpop.xlane.xlu1 %253 }
 0x198   :  { %v279_v17 = vmul.f32 0.03125, %v252_v15  ;;  %v280_v18 = vmul.f32 0.03125, %v254_v16  ;;  %v957_v19 = vsel %vm309_vm0, %v297_v12, 0.0  ;;  %v967_v24 = vsel %vm309_vm0, %v298_v13, 0.0  ;;  %v1014_v13 = vld [vmem:[%s1095_s2] ss:$0 sm:$0xff] }
 0x199   :  { %v334_v20 = vmul.f32 %v957_v19, %v957_v19 }
 0x19a   :  { %v295_v22 = vsub.f32 %v879_v26, %v279_v17  ;;  %v296_v23 = vsub.f32 %v887_v30, %v280_v18  ;;  %v335_v26 = vmul.f32 %v967_v24, %v967_v24 }
 0x19b   :  { %356 = vadd.xlane.f32.xlu0 %v334_v20  ;;  %v268_v28 = vpop.xlane.xlu0 %267  ;;  %362 = vadd.xlane.f32.xlu1 %v337_v21  ;;  %v270_v32 = vpop.xlane.xlu1 %269 }
 0x19c   :  { %v287_v34 = vmul.f32 0.03125, %v268_v28  ;;  %v288_v35 = vmul.f32 0.03125, %v270_v32  ;;  %v971_v36 = vsel %vm309_vm0, %v295_v22, 0.0  ;;  %v981_v39 = vsel %vm309_vm0, %v296_v23, 0.0  ;;  %v1021_v32 = vld [vmem:[%s1096_s3] ss:$0 sm:$0xff] }
 0x19d   :  { %v332_v37 = vmul.f32 %v971_v36, %v971_v36 }
 0x19e   :  { %v303_v30 = vsub.f32 %v881_v27, %v287_v34  ;;  %v304_v38 = vsub.f32 %v889_v31, %v288_v35  ;;  %v333_v27 = vmul.f32 %v981_v39, %v981_v39 }
 0x19f   :  { %352 = vadd.xlane.f32.xlu0 %v332_v37  ;;  %v272_v40 = vpop.xlane.xlu0 %271  ;;  %358 = vadd.xlane.f32.xlu1 %v335_v26  ;;  %v274_v41 = vpop.xlane.xlu1 %273 }
 0x1a0   :  { %v289_v42 = vmul.f32 0.03125, %v272_v40  ;;  %v290_v43 = vmul.f32 0.03125, %v274_v41  ;;  %v985_v45 = vsel %vm309_vm0, %v303_v30, 0.0  ;;  %v995_v49 = vsel %vm309_vm0, %v304_v38, 0.0 }
 0x1a1   :  { %v340_v46 = vmul.f32 %v985_v45, %v985_v45  ;;  %v341_v52 = vmul.f32 %v995_v49, %v995_v49 }
 0x1a2   :  { %v305_v31 = vsub.f32 %v876_v25, %v289_v42  ;;  %v306_v47 = vsub.f32 %v885_v29, %v290_v43 }
 0x1a3   :  { %368 = vadd.xlane.f32.xlu0 %v340_v46  ;;  %354 = vadd.xlane.f32.xlu1 %v333_v27 }
 0x1a4   :  { %v999_v50 = vsel %vm309_vm0, %v305_v31, 0.0  ;;  %v1007_v25 = vsel %vm309_vm0, %v306_v47, 0.0 }
 0x1a5   :  { %v342_v51 = vmul.f32 %v999_v50, %v999_v50  ;;  %v343_v29 = vmul.f32 %v1007_v25, %v1007_v25 }
 0x1a7   :  { %372 = vadd.xlane.f32.xlu0 %v342_v51  ;;  %370 = vadd.xlane.f32.xlu1 %v341_v52 }
 0x1ab   :  { %374 = vadd.xlane.f32.xlu1 %v343_v29 }
 0x218   :  { %v349_v54 = vpop.xlane.xlu0 %348 }
 0x219   :  { %v378_v55 = vmul.f32 0.03125, %v349_v54 }
 0x21b   :  { %v394_v56 = vadd.f32 1e-05, %v378_v55 }
 0x21c   :  { %v365_v57 = vpop.xlane.xlu0 %364  ;;  %v351_v59 = vpop.xlane.xlu1 %350 }
 0x21d   :  { %763 = vrsqrt.f32 %v394_v56  ;;  %v386_v60 = vmul.f32 0.03125, %v365_v57  ;;  %v379_v61 = vmul.f32 0.03125, %v351_v59 }
 0x21f   :  { %v402_v62 = vadd.f32 1e-05, %v386_v60  ;;  %v395_v0 = vadd.f32 1e-05, %v379_v61 }
 0x220   :  { %v345_v1 = vpop.xlane.xlu0 %344  ;;  %v367_v33 = vpop.xlane.xlu1 %366 }
 0x221   :  { %765 = vrsqrt.f32 %v402_v62  ;;  %v376_v2 = vmul.f32 0.03125, %v345_v1  ;;  %v387_v3 = vmul.f32 0.03125, %v367_v33 }
 0x222   :  { %767 = vrsqrt.f32 %v395_v0 }
 0x223   :  { %v392_v5 = vadd.f32 1e-05, %v376_v2  ;;  %v403_v6 = vadd.f32 1e-05, %v387_v3 }
 0x224   :  { %v361_v7 = vpop.xlane.xlu0 %360  ;;  %v347_v8 = vpop.xlane.xlu1 %346 }
 0x225   :  { %769 = vrsqrt.f32 %v392_v5  ;;  %v384_v10 = vmul.f32 0.03125, %v361_v7  ;;  %v377_v11 = vmul.f32 0.03125, %v347_v8 }
 0x226   :  { %771 = vrsqrt.f32 %v403_v6 }
 0x227   :  { %v764_v12 = vpop.eup %763  ;;  %v400_v15 = vadd.f32 1e-05, %v384_v10  ;;  %v393_v16 = vadd.f32 1e-05, %v377_v11 }
 0x228   :  { %v426_v17 = vmul.f32 %v764_v12, %v906_v44  ;;  %v357_v18 = vpop.xlane.xlu0 %356  ;;  %v363_v20 = vpop.xlane.xlu1 %362 }
 0x229   :  { %773 = vrsqrt.f32 %v400_v15  ;;  %v382_v21 = vmul.f32 0.03125, %v357_v18  ;;  %v385_v22 = vmul.f32 0.03125, %v363_v20 }
 0x22a   :  { %v449_v23 = vmul.f32 %v1014_v13, %v426_v17  ;;  %775 = vrsqrt.f32 %v393_v16 }
 0x22b   :  { %v766_v28 = vpop.eup %765  ;;  %v398_v34 = vadd.f32 1e-05, %v382_v21  ;;  %v401_v35 = vadd.f32 1e-05, %v385_v22 }
 0x22c   :  { %v768_v37 = vpop.eup %767  ;;  %v434_v26 = vmul.f32 %v766_v28, %v912_v48  ;;  %v353_v44 = vpop.xlane.xlu0 %352  ;;  %v472_v42 = vadd.f32 %v1021_v32, %v449_v23 }
 0x22d   :  { %v359_v30 = vpop.xlane.xlu1 %358  ;;  %v427_v38 = vmul.f32 %v768_v37, %v916_v53  ;;  %777 = vrsqrt.f32 %v398_v34  ;;  %v380_v40 = vmul.f32 0.03125, %v353_v44 }
 0x22e   :  { %v383_v41 = vmul.f32 0.03125, %v359_v30  ;;  %779 = vrsqrt.f32 %v401_v35  ;;  %v457_v46 = vmul.f32 %v1014_v13, %v434_v26  ;;  %v488_v56 = vmax.f32 %v472_v42, 0.0 }
 0x22f   :  { %v770_v43 = vpop.eup %769  ;;  %v450_v27 = vmul.f32 %v1014_v13, %v427_v38  ;;  %v396_v31 = vadd.f32 1e-05, %v380_v40 }
 0x230   :  { %v399_v47 = vadd.f32 1e-05, %v383_v41  ;;  %v772_v51 = vpop.eup %771  ;;  %v424_v48 = vmul.f32 %v770_v43, %v925_v58  ;;  %v369_v52 = vpop.xlane.xlu0 %368  ;;  %v480_v61 = vadd.f32 %v1021_v32, %v457_v46 }
 0x231   :  { %v355_v29 = vpop.xlane.xlu1 %354  ;;  %v473_v53 = vadd.f32 %v1021_v32, %v450_v27  ;;  %v435_v54 = vmul.f32 %v772_v51, %v929_v63  ;;  %781 = vrsqrt.f32 %v396_v31  ;;  %v388_v55 = vmul.f32 0.03125, %v369_v52 }
 0x232   :  { %v447_v57 = vmul.f32 %v1014_v13, %v424_v48  ;;  %783 = vrsqrt.f32 %v399_v47  ;;  %v381_v59 = vmul.f32 0.03125, %v355_v29  ;;  %v496_v15 = vmax.f32 %v480_v61, 0.0 }
 0x233   :  { %v774_v60 = vpop.eup %773  ;;  %v489_v62 = vmax.f32 %v473_v53, 0.0  ;;  %v458_v0 = vmul.f32 %v1014_v13, %v435_v54  ;;  %v404_v58 = vadd.f32 1e-05, %v388_v55 }
 0x234   :  { %v776_v1 = vpop.eup %775  ;;  %v432_v33 = vmul.f32 %v774_v60, %v939_v4  ;;  %v397_v2 = vadd.f32 1e-05, %v381_v59  ;;  %v373_v3 = vpop.xlane.xlu0 %372  ;;  %v470_v8 = vadd.f32 %v1021_v32, %v447_v57 }
 0x235   :  { %v371_v63 = vpop.xlane.xlu1 %370  ;;  %v644_v5 = vpack.c.bf16 %v489_v62, %v488_v56  ;;  %v481_v6 = vadd.f32 %v1021_v32, %v458_v0  ;;  %v425_v7 = vmul.f32 %v776_v1, %v943_v9  ;;  %785 = vrsqrt.f32 %v404_v58 }
 0x236   :  { %v455_v10 = vmul.f32 %v1014_v13, %v432_v33  ;;  %787 = vrsqrt.f32 %v397_v2  ;;  %v390_v11 = vmul.f32 0.03125, %v373_v3  ;;  %v389_v17 = vmul.f32 0.03125, %v371_v63 }
 0x237   :  { %v778_v12 = vpop.eup %777  ;;  %676 = vst [vmem:[%s1097_s4 + $0x8] sm:$0xff] %v644_v5   ;;  %v497_v4 = vmax.f32 %v481_v6, 0.0  ;;  %v448_v16 = vmul.f32 %v1014_v13, %v425_v7  ;;  %v486_v35 = vmax.f32 %v470_v8, 0.0 }
 0x238   :  { %v780_v18 = vpop.eup %779  ;;  %v430_v9 = vmul.f32 %v778_v12, %v957_v19  ;;  %v406_v20 = vadd.f32 1e-05, %v390_v11  ;;  %v405_v34 = vadd.f32 1e-05, %v389_v17  ;;  %v478_v37 = vadd.f32 %v1021_v32, %v455_v10 }
 0x239   :  { %v375_v21 = vpop.xlane.xlu1 %374  ;;  %v664_v22 = vpack.c.bf16 %v497_v4, %v496_v15  ;;  %v471_v23 = vadd.f32 %v1021_v32, %v448_v16  ;;  %v433_v28 = vmul.f32 %v780_v18, %v953_v14 }
 0x23a   :  { %789 = vrsqrt.f32 %v406_v20  ;;  %v391_v26 = vmul.f32 0.03125, %v375_v21  ;;  %v453_v19 = vmul.f32 %v1014_v13, %v430_v9  ;;  %v494_v27 = vmax.f32 %v478_v37, 0.0 }
 0x23b   :  { %v782_v44 = vpop.eup %781  ;;  %680 = vst [vmem:[%s1097_s4 + $0x28] sm:$0xff] %v664_v22   ;;  %v487_v30 = vmax.f32 %v471_v23, 0.0  ;;  %v456_v38 = vmul.f32 %v1014_v13, %v433_v28  ;;  %791 = vrsqrt.f32 %v405_v34 }
 0x23c   :  { %v784_v40 = vpop.eup %783  ;;  %v428_v14 = vmul.f32 %v782_v44, %v971_v36  ;;  %v407_v41 = vadd.f32 1e-05, %v391_v26  ;;  %v476_v47 = vadd.f32 %v1021_v32, %v453_v19 }
 0x23d   :  { %v639_v42 = vpack.c.bf16 %v487_v30, %v486_v35  ;;  %v479_v43 = vadd.f32 %v1021_v32, %v456_v38  ;;  %v431_v46 = vmul.f32 %v784_v40, %v967_v24 }
 0x23e   :  { %793 = vrsqrt.f32 %v407_v41  ;;  %v451_v48 = vmul.f32 %v1014_v13, %v428_v14  ;;  %v492_v55 = vmax.f32 %v476_v47, 0.0 }
 0x23f   :  { %v786_v31 = vpop.eup %785  ;;  %640 = vst [vmem:[%s1097_s4] sm:$0xff] %v639_v42   ;;  %v495_v51 = vmax.f32 %v479_v43, 0.0  ;;  %v454_v36 = vmul.f32 %v1014_v13, %v431_v46 }
 0x240   :  { %v788_v52 = vpop.eup %787  ;;  %v436_v29 = vmul.f32 %v786_v31, %v985_v45  ;;  %v474_v56 = vadd.f32 %v1021_v32, %v451_v48 }
 0x241   :  { %v659_v53 = vpack.c.bf16 %v495_v51, %v494_v27  ;;  %v477_v24 = vadd.f32 %v1021_v32, %v454_v36  ;;  %v429_v54 = vmul.f32 %v788_v52, %v981_v39 }
 0x242   :  { %v459_v61 = vmul.f32 %v1014_v13, %v436_v29  ;;  %v490_v1 = vmax.f32 %v474_v56, 0.0 }
 0x243   :  { %679 = vst [vmem:[%s1097_s4 + $0x20] sm:$0xff] %v659_v53   ;;  %v493_v57 = vmax.f32 %v477_v24, 0.0  ;;  %v452_v59 = vmul.f32 %v1014_v13, %v429_v54 }
 0x244   :  { %v790_v60 = vpop.eup %789  ;;  %v482_v63 = vadd.f32 %v1021_v32, %v459_v61 }
 0x245   :  { %v792_v62 = vpop.eup %791  ;;  %v654_v45 = vpack.c.bf16 %v493_v57, %v492_v55  ;;  %v475_v0 = vadd.f32 %v1021_v32, %v452_v59  ;;  %v438_v58 = vmul.f32 %v790_v60, %v999_v50 }
 0x246   :  { %v437_v39 = vmul.f32 %v792_v62, %v995_v49  ;;  %v498_v10 = vmax.f32 %v482_v63, 0.0 }
 0x247   :  { %678 = vst [vmem:[%s1097_s4 + $0x18] sm:$0xff] %v654_v45   ;;  %v491_v33 = vmax.f32 %v475_v0, 0.0  ;;  %v461_v2 = vmul.f32 %v1014_v13, %v438_v58 }
 0x248   :  { %v794_v3 = vpop.eup %793  ;;  %v460_v5 = vmul.f32 %v1014_v13, %v437_v39 }
 0x249   :  { %v649_v6 = vpack.c.bf16 %v491_v33, %v490_v1  ;;  %v439_v7 = vmul.f32 %v794_v3, %v1007_v25  ;;  %v484_v49 = vadd.f32 %v1021_v32, %v461_v2 }
 0x24a   :  { %v483_v50 = vadd.f32 %v1021_v32, %v460_v5 }
 0x24b   :  { %677 = vst [vmem:[%s1097_s4 + $0x10] sm:$0xff] %v649_v6   ;;  %v462_v8 = vmul.f32 %v1014_v13, %v439_v7  ;;  %v500_v4 = vmax.f32 %v484_v49, 0.0 }
 0x24c   :  { %v499_v11 = vmax.f32 %v483_v50, 0.0 }
 0x24d   :  { %v485_v12 = vadd.f32 %v1021_v32, %v462_v8 }
 0x24e   :  { %v669_v15 = vpack.c.bf16 %v499_v11, %v498_v10 }
 0x24f   :  { %v501_v16 = vmax.f32 %v485_v12, 0.0 }
 0x250   :  { %681 = vst [vmem:[%s1097_s4 + $0x30] sm:$0xff] %v669_v15  }
 0x251   :  { %v674_v25 = vpack.c.bf16 %v501_v16, %v500_v4 }
 0x253   :  { %682 = vst [vmem:[%s1097_s4 + $0x38] sm:$0xff] %v674_v25  }

</bundles_post_ra>
